<compile_context>
chip_gen: v7x
topology: tpu7x:2x2x1
jax: 0.10.0
libtpu: 0.0.40
codegen_flags: <defaults>
</compile_context>

<pallas_src>
import jax
import jax.numpy as jnp
from jax.experimental import pallas as pl
from jax.experimental.pallas import tpu as pltpu


# ----------------------------------------------------------------------------
# Fused kernel: conv3x3(BN folded)+ReLU -> key_sum -> query -> attn -> gamma
#               -> scaled output, for nb batch elements per grid step.
# ----------------------------------------------------------------------------
def _cmam_fused_kernel(patch_ref, txt_ref, wvt_ref, vtb_ref,
                       wk_ref, kb_ref, wq_ref, qb_ref,
                       wg_ref, gb_ref, o_ref):
    # patch_ref: (9*Cin, nb*HW)  im2col patches, channels-first, batches on lanes
    # txt_ref:   (nb, C, T)
    # wvt_ref:   (Cout, 9*Cin)   conv weight, BN scale folded
    # vtb_ref:   (Cout, 1)       folded BN bias
    # wk_ref:    (C, Cout)       v_key 1x1 weight, BN scale folded
    # kb_ref:    (C, 1)          HW * folded BN bias (spatial-sum absorbed)
    # wq_ref:    (C, C)          l_query conv1d weight, BN1d scale folded
    # qb_ref:    (C, 1)
    # wg_ref:    (Cout, C)       gamma Linear weight (transposed)
    # gb_ref:    (Cout, 1)
    # o_ref:     (nb, Cout, HW)  NCHW-flattened output block
    nb, Cout, HW = o_ref.shape
    C, T = txt_ref.shape[1], txt_ref.shape[2]

    # Hoist loop-invariant parameter loads (do NOT reload inside unrolled loops).
    wvt = wvt_ref[...]
    vtb = vtb_ref[...]
    wk, kb = wk_ref[...], kb_ref[...]
    wq, qb = wq_ref[...], qb_ref[...]
    wg, gb = wg_ref[...], gb_ref[...]

    # ---- Phase 0: fused ConvBN(3x3)+ReLU for all nb batches, ONE MXU matmul (K=9*Cin)
    up = jnp.dot(wvt, patch_ref[...], preferred_element_type=jnp.float32)   # (Cout, nb*HW)
    up = jnp.maximum(up + vtb, 0.0)

    # ---- Phase 1: per-batch spatial sums (lane reductions on VPU/XLU, hidden
    #      under the conv matmul) assembled into ONE (Cout, nb) operand, and the
    #      text block flattened to (C, nb*T) so the projections batch over nb.
    up_sum = jnp.concatenate(
        [jnp.sum(up[:, b * HW:(b + 1) * HW], axis=-1, keepdims=True)
         for b in range(nb)], axis=-1)                                       # (Cout, nb)
    txt_flat = jnp.concatenate([txt_ref[b] for b in range(nb)], axis=-1)     # (C, nb*T)

    # ---- Phase 2: batched projections — 2 MXU matmuls independent of nb.
    # key_sum: spatial sum commutes with 1x1 conv + BN (exact simplification)
    key_sum = jnp.dot(wk, up_sum, preferred_element_type=jnp.float32) + kb   # (C, nb)
    # l_query: 1x1 conv1d (BN1d folded), all batches at once
    query = jnp.dot(wq, txt_flat, preferred_element_type=jnp.float32) + qb   # (C, nb*T)

    # ---- Phase 3: per-batch attention epilogue (tiny (1,T)/(C,T) VPU/XLU/EUP work)
    w_cols = []
    for b in range(nb):                                                      # static unroll
        ks_b = key_sum[:, b:b + 1]                                           # (C, 1)
        q_b = query[:, b * T:(b + 1) * T]                                    # (C, T)

        # attn = einsum('bcn,bct->bnt').sum(n) == <key_sum, query> over C
        attn = jnp.sum(ks_b * q_b, axis=0, keepdims=True)                    # (1, T)
        norm = jnp.sqrt(jnp.sum(attn * attn, axis=-1, keepdims=True))
        attn = attn / jnp.maximum(norm, 1e-12)                               # F.normalize(p=2)
        # |attn| <= 1 after L2 normalization -> exp cannot overflow; max-shift dropped.
        e = jnp.exp(attn)
        p = e / jnp.sum(e, axis=-1, keepdims=True)                           # softmax over T

        # weighted_txt column for this batch
        w_cols.append(jnp.sum(txt_ref[b] * p, axis=-1, keepdims=True))       # (C, 1)

    weighted = jnp.concatenate(w_cols, axis=-1)                              # (C, nb)

    # gamma = sigmoid(Linear(weighted_txt)) — ONE batched MXU matmul.
    gamma = jax.nn.sigmoid(
        jnp.dot(wg, weighted, preferred_element_type=jnp.float32) + gb)      # (Cout, nb)

    # ---- Phase 4: scale & store per batch, directly in NCHW-flattened layout.
    for b in range(nb):                                                      # static unroll
        o_ref[b] = (up[:, b * HW:(b + 1) * HW]
                    * gamma[:, b:b + 1]).astype(o_ref.dtype)                 # (Cout, HW)


# ----------------------------------------------------------------------------
# Wrapper: im2col, BN folding, batch packing, pallas_call
# ----------------------------------------------------------------------------
def _pick_batches_per_step(B, HW):
    # Largest divisor of B (<= 8) whose packed lane width nb*HW is 128-aligned;
    # fall back to nb = B (full-array block is always layout-legal).
    for cand in range(min(B, 8), 0, -1):
        if B % cand == 0 and (cand * HW) % 128 == 0:
            return cand
    return B


def cmam_forward(visual_feat_nchw, spatial_nchw, txt, params,
                 *, matmul_dtype=jnp.float32):
    B, _, H, W = visual_feat_nchw.shape
    HW = H * W
    Cout = params["w_vt"].shape[-1]
    C, T = txt.shape[1], txt.shape[2]

    nb = _pick_batches_per_step(B, HW)
    grid = (B // nb,)

    # concat([visual, spatial], channel) and im2col (channels-first) in XLA.
    x = jnp.concatenate([visual_feat_nchw, spatial_nchw], axis=1).astype(jnp.float32)
    Cin = x.shape[1]
    xp = jnp.pad(x, ((0, 0), (0, 0), (1, 1), (1, 1)))            # pad=1 ('SAME', k=3)
    taps = [xp[:, :, dy:dy + H, dx:dx + W] for dy in range(3) for dx in range(3)]
    patches = jnp.concatenate(taps, axis=1)                      # (B, 9*Cin, H, W)
    patches = patches.reshape(B, 9 * Cin, HW)
    patches = jnp.transpose(patches, (1, 0, 2)).reshape(9 * Cin, B * HW)

    # Fold BN (eval) scales into weights; biases become columns.
    w_vt = params["w_vt"].reshape(9 * Cin, Cout).T               # (Cout, 9*Cin), tap-major matches patches
    w_vt = w_vt * params["vt_scale"][:, None]
    vt_b = params["vt_bias"][:, None]                            # (Cout, 1)

    wk = params["w_key"].T * params["k_scale"][:, None]          # (C, Cout)
    kb = (HW * params["k_bias"])[:, None]                        # (C, 1) -- spatial sum of bias

    wq = params["w_q"] * params["q_scale"][:, None]              # (C, C)
    qb = params["q_bias"][:, None]                               # (C, 1)

    wg = params["w_g"].T                                         # (Cout, C)
    gb = params["g_bias"][:, None]                               # (Cout, 1)

    patches = patches.astype(matmul_dtype)
    w_vt = w_vt.astype(matmul_dtype)

    out_flat = pl.pallas_call(
        _cmam_fused_kernel,
        out_shape=jax.ShapeDtypeStruct((B, Cout, HW), jnp.float32),
        grid=grid,
        in_specs=[
            pl.BlockSpec((9 * Cin, nb * HW), lambda i: (0, i)),
            pl.BlockSpec((nb, C, T), lambda i: (i, 0, 0)),
            pl.BlockSpec((Cout, 9 * Cin), lambda i: (0, 0)),
            pl.BlockSpec((Cout, 1), lambda i: (0, 0)),
            pl.BlockSpec((C, Cout), lambda i: (0, 0)),
            pl.BlockSpec((C, 1), lambda i: (0, 0)),
            pl.BlockSpec((C, C), lambda i: (0, 0)),
            pl.BlockSpec((C, 1), lambda i: (0, 0)),
            pl.BlockSpec((Cout, C), lambda i: (0, 0)),
            pl.BlockSpec((Cout, 1), lambda i: (0, 0)),
        ],
        out_specs=pl.BlockSpec((nb, Cout, HW), lambda i: (i, 0, 0)),
        compiler_params=pltpu.CompilerParams(dimension_semantics=("parallel",)),
    )(patches, txt.astype(jnp.float32), w_vt, vt_b, wk, kb, wq, qb, wg, gb)

    return out_flat.reshape(B, Cout, H, W)                       # NCHW, no transpose needed


# ----------------------------------------------------------------------------
# Deterministic parameter init + BN folding (eval mode)
# ----------------------------------------------------------------------------
def _fold_bn(w, b, mean, var, eps=1e-5):
    scale = w / jnp.sqrt(var + eps)
    return scale, b - mean * scale


def init_params(key, cin_v, cout, c_txt):
    cin = cin_v + 8
    ks = jax.random.split(key, 17)

    def normal(k, shape, s=0.1):
        return s * jax.random.normal(k, shape, jnp.float32)

    def bn(kw, kb, km, kv, n):
        w = 1.0 + 0.1 * jax.random.normal(kw, (n,), jnp.float32)
        b = 0.05 * jax.random.normal(kb, (n,), jnp.float32)
        m = 0.02 * jax.random.normal(km, (n,), jnp.float32)
        v = 1.0 + 0.1 * jnp.abs(jax.random.normal(kv, (n,), jnp.float32))
        return _fold_bn(w, b, m, v)

    vt_scale, vt_bias = bn(ks[1], ks[2], ks[3], ks[4], cout)
    k_scale, k_bias = bn(ks[6], ks[7], ks[8], ks[9], c_txt)
    q_scale, q_bias = bn(ks[11], ks[12], ks[13], ks[14], c_txt)

    return dict(
        w_vt=normal(ks[0], (3, 3, cin, cout)),        # HWIO
        vt_scale=vt_scale, vt_bias=vt_bias,
        w_key=normal(ks[5], (cout, c_txt)),           # v_key 1x1 conv (transposed)
        k_scale=k_scale, k_bias=k_bias,
        w_q=normal(ks[10], (c_txt, c_txt)),           # l_query conv1d
        q_scale=q_scale, q_bias=q_bias,
        w_g=normal(ks[15], (c_txt, cout)),            # gamma Linear (transposed)
        g_bias=normal(ks[16], (cout,), 0.05),
    )


# ----------------------------------------------------------------------------
# Pure-JAX reference (for correctness check)
# ----------------------------------------------------------------------------
def reference_forward(visual_feat, spatial, txt, p):
    x = jnp.concatenate([visual_feat, spatial], axis=1)
    up = jax.lax.conv_general_dilated(
        x, p["w_vt"], (1, 1), ((1, 1), (1, 1)),
        dimension_numbers=("NCHW", "HWIO", "NCHW"))
    up = up * p["vt_scale"][None, :, None, None] + p["vt_bias"][None, :, None, None]
    up = jnp.maximum(up, 0.0)
    key = jnp.einsum("oc,bohw->bchw", p["w_key"], up)
    key = key * p["k_scale"][None, :, None, None] + p["k_bias"][None, :, None, None]
    B, C = key.shape[0], key.shape[1]
    key = key.reshape(B, C, -1)
    query = jnp.einsum("oc,bct->bot", p["w_q"], txt)
    query = query * p["q_scale"][None, :, None] + p["q_bias"][None, :, None]
    attn = jnp.einsum("bcn,bct->bnt", key, query).sum(1, keepdims=True)
    norm = jnp.sqrt(jnp.sum(attn ** 2, axis=-1, keepdims=True))
    attn = attn / jnp.maximum(norm, 1e-12)
    attn = jax.nn.softmax(attn, axis=-1)
    weighted = (attn * txt).sum(-1)
    gamma = jax.nn.sigmoid(weighted @ p["w_g"] + p["g_bias"])
    return up * gamma[:, :, None, None]


if __name__ == "__main__":
    B, Cin_v, Cout, C_txt, H, W, T = 2, 8, 16, 16, 8, 8, 8
    key = jax.random.PRNGKey(0)
    k1, k2, k3, kp = jax.random.split(key, 4)
    visual_feat = jax.random.normal(k1, (B, Cin_v, H, W), jnp.float32)   # NCHW
    spatial = jax.random.normal(k2, (B, 8, H, W), jnp.float32)           # NCHW
    txt = jax.random.normal(k3, (B, C_txt, T), jnp.float32)

    params = init_params(kp, Cin_v, Cout, C_txt)

    out = cmam_forward(visual_feat, spatial, txt, params)
    out = jax.block_until_ready(out)

    ref = reference_forward(visual_feat, spatial, txt, params)
    assert out.shape == (B, Cout, H, W)
    assert jnp.allclose(out, ref, atol=1e-3, rtol=1e-3), float(jnp.max(jnp.abs(out - ref)))
    print("KERNEL_OK")
</pallas_src>

<mosaic_0001>
module attributes {stable_mosaic.version = 11 : i64} {
  func.func @_cmam_fused_kernel(%arg0: i32, %arg1: memref<144x128xf32, #tpu.memory_space<vmem>>, %arg2: memref<2x16x8xf32, #tpu.memory_space<vmem>>, %arg3: memref<16x144xf32, #tpu.memory_space<vmem>>, %arg4: memref<16x1xf32, #tpu.memory_space<vmem>>, %arg5: memref<16x16xf32, #tpu.memory_space<vmem>>, %arg6: memref<16x1xf32, #tpu.memory_space<vmem>>, %arg7: memref<16x16xf32, #tpu.memory_space<vmem>>, %arg8: memref<16x1xf32, #tpu.memory_space<vmem>>, %arg9: memref<16x16xf32, #tpu.memory_space<vmem>>, %arg10: memref<16x1xf32, #tpu.memory_space<vmem>>, %arg11: memref<2x16x64xf32, #tpu.memory_space<vmem>>) attributes {dimension_semantics = [#tpu.dimension_semantics<parallel>], iteration_bounds = array<i64: 1>, scalar_prefetch = 0 : i64, scratch_operands = 0 : i64, tpu.core_type = #tpu.core_type<tc>, window_params = [{transform_indices = @transform_0, window_bounds = array<i64: 144, 128>}, {transform_indices = @transform_1, window_bounds = array<i64: 2, 16, 8>}, {pipeline_mode = #tpu.pipeline_mode<synchronous>, transform_indices = @transform_2, window_bounds = array<i64: 16, 144>}, {pipeline_mode = #tpu.pipeline_mode<synchronous>, transform_indices = @transform_3, window_bounds = array<i64: 16, 1>}, {pipeline_mode = #tpu.pipeline_mode<synchronous>, transform_indices = @transform_4, window_bounds = array<i64: 16, 16>}, {pipeline_mode = #tpu.pipeline_mode<synchronous>, transform_indices = @transform_5, window_bounds = array<i64: 16, 1>}, {pipeline_mode = #tpu.pipeline_mode<synchronous>, transform_indices = @transform_6, window_bounds = array<i64: 16, 16>}, {pipeline_mode = #tpu.pipeline_mode<synchronous>, transform_indices = @transform_7, window_bounds = array<i64: 16, 1>}, {pipeline_mode = #tpu.pipeline_mode<synchronous>, transform_indices = @transform_8, window_bounds = array<i64: 16, 16>}, {pipeline_mode = #tpu.pipeline_mode<synchronous>, transform_indices = @transform_9, window_bounds = array<i64: 16, 1>}, {transform_indices = @transform_10, window_bounds = array<i64: 2, 16, 64>}]} {
    %c0 = arith.constant 0 : index
    %c0_0 = arith.constant 0 : index
    %0 = vector.load %arg3[%c0, %c0_0] : memref<16x144xf32, #tpu.memory_space<vmem>>, vector<16x144xf32>
    %c0_1 = arith.constant 0 : index
    %c0_2 = arith.constant 0 : index
    %1 = vector.load %arg4[%c0_1, %c0_2] : memref<16x1xf32, #tpu.memory_space<vmem>>, vector<16x1xf32>
    %c0_3 = arith.constant 0 : index
    %c0_4 = arith.constant 0 : index
    %2 = vector.load %arg5[%c0_3, %c0_4] : memref<16x16xf32, #tpu.memory_space<vmem>>, vector<16x16xf32>
    %c0_5 = arith.constant 0 : index
    %c0_6 = arith.constant 0 : index
    %3 = vector.load %arg6[%c0_5, %c0_6] : memref<16x1xf32, #tpu.memory_space<vmem>>, vector<16x1xf32>
    %c0_7 = arith.constant 0 : index
    %c0_8 = arith.constant 0 : index
    %4 = vector.load %arg7[%c0_7, %c0_8] : memref<16x16xf32, #tpu.memory_space<vmem>>, vector<16x16xf32>
    %c0_9 = arith.constant 0 : index
    %c0_10 = arith.constant 0 : index
    %5 = vector.load %arg8[%c0_9, %c0_10] : memref<16x1xf32, #tpu.memory_space<vmem>>, vector<16x1xf32>
    %c0_11 = arith.constant 0 : index
    %c0_12 = arith.constant 0 : index
    %6 = vector.load %arg9[%c0_11, %c0_12] : memref<16x16xf32, #tpu.memory_space<vmem>>, vector<16x16xf32>
    %c0_13 = arith.constant 0 : index
    %c0_14 = arith.constant 0 : index
    %7 = vector.load %arg10[%c0_13, %c0_14] : memref<16x1xf32, #tpu.memory_space<vmem>>, vector<16x1xf32>
    %c0_15 = arith.constant 0 : index
    %c0_16 = arith.constant 0 : index
    %8 = vector.load %arg1[%c0_15, %c0_16] : memref<144x128xf32, #tpu.memory_space<vmem>>, vector<144x128xf32>
    %cst = arith.constant dense<0.000000e+00> : vector<16x128xf32>
    %9 = tpu.matmul %0, %8, %cst {dimension_numbers = #tpu.dot_dimension_numbers<[1], [0], [0], [1], [0, 0, 1, 1], [], []>} : vector<16x144xf32>, vector<144x128xf32>, vector<16x128xf32> -> vector<16x128xf32>
    %10 = vector.broadcast %1 : vector<16x1xf32> to vector<16x128xf32>
    %11 = arith.addf %9, %10 : vector<16x128xf32>
    %cst_17 = arith.constant 0.000000e+00 : f32
    %12 = vector.broadcast %cst_17 : f32 to vector<16x128xf32>
    %13 = arith.maximumf %11, %12 : vector<16x128xf32>
    %14 = vector.extract_strided_slice %13 {offsets = [0, 0], sizes = [16, 64], strides = [1, 1]} : vector<16x128xf32> to vector<16x64xf32>
    %cst_18 = arith.constant dense<0.000000e+00> : vector<16xf32>
    %15 = vector.multi_reduction <add>, %14, %cst_18 [1] : vector<16x64xf32> to vector<16xf32>
    %16 = vector.shape_cast %15 : vector<16xf32> to vector<16x1xf32>
    %17 = vector.extract_strided_slice %13 {offsets = [0, 64], sizes = [16, 64], strides = [1, 1]} : vector<16x128xf32> to vector<16x64xf32>
    %cst_19 = arith.constant dense<0.000000e+00> : vector<16xf32>
    %18 = vector.multi_reduction <add>, %17, %cst_19 [1] : vector<16x64xf32> to vector<16xf32>
    %19 = vector.shape_cast %18 : vector<16xf32> to vector<16x1xf32>
    %20 = tpu.concatenate %16, %19 in 1 : vector<16x1xf32>, vector<16x1xf32> -> vector<16x2xf32>
    %c0_20 = arith.constant 0 : index
    %c0_21 = arith.constant 0 : index
    %c0_22 = arith.constant 0 : index
    %21 = vector.load %arg2[%c0_20, %c0_21, %c0_22] : memref<2x16x8xf32, #tpu.memory_space<vmem>>, vector<1x16x8xf32>
    %22 = vector.shape_cast %21 : vector<1x16x8xf32> to vector<16x8xf32>
    %c1 = arith.constant 1 : index
    %c0_23 = arith.constant 0 : index
    %c0_24 = arith.constant 0 : index
    %23 = vector.load %arg2[%c1, %c0_23, %c0_24] : memref<2x16x8xf32, #tpu.memory_space<vmem>>, vector<1x16x8xf32>
    %24 = vector.shape_cast %23 : vector<1x16x8xf32> to vector<16x8xf32>
    %25 = tpu.concatenate %22, %24 in 1 : vector<16x8xf32>, vector<16x8xf32> -> vector<16x16xf32>
    %cst_25 = arith.constant dense<0.000000e+00> : vector<16x2xf32>
    %26 = tpu.matmul %2, %20, %cst_25 {dimension_numbers = #tpu.dot_dimension_numbers<[1], [0], [0], [1], [0, 0, 1, 1], [], []>} : vector<16x16xf32>, vector<16x2xf32>, vector<16x2xf32> -> vector<16x2xf32>
    %27 = vector.broadcast %3 : vector<16x1xf32> to vector<16x2xf32>
    %28 = arith.addf %26, %27 : vector<16x2xf32>
    %cst_26 = arith.constant dense<0.000000e+00> : vector<16x16xf32>
    %29 = tpu.matmul %4, %25, %cst_26 {dimension_numbers = #tpu.dot_dimension_numbers<[1], [0], [0], [1], [0, 0, 1, 1], [], []>} : vector<16x16xf32>, vector<16x16xf32>, vector<16x16xf32> -> vector<16x16xf32>
    %30 = vector.broadcast %5 : vector<16x1xf32> to vector<16x16xf32>
    %31 = arith.addf %29, %30 : vector<16x16xf32>
    %32 = vector.extract_strided_slice %28 {offsets = [0, 0], sizes = [16, 1], strides = [1, 1]} : vector<16x2xf32> to vector<16x1xf32>
    %33 = vector.extract_strided_slice %31 {offsets = [0, 0], sizes = [16, 8], strides = [1, 1]} : vector<16x16xf32> to vector<16x8xf32>
    %34 = vector.broadcast %32 : vector<16x1xf32> to vector<16x8xf32>
    %35 = arith.mulf %34, %33 : vector<16x8xf32>
    %cst_27 = arith.constant dense<0.000000e+00> : vector<8xf32>
    %36 = vector.multi_reduction <add>, %35, %cst_27 [0] : vector<16x8xf32> to vector<8xf32>
    %37 = vector.shape_cast %36 : vector<8xf32> to vector<1x8xf32>
    %38 = arith.mulf %37, %37 : vector<1x8xf32>
    %cst_28 = arith.constant dense<0.000000e+00> : vector<1xf32>
    %39 = vector.multi_reduction <add>, %38, %cst_28 [1] : vector<1x8xf32> to vector<1xf32>
    %40 = vector.shape_cast %39 : vector<1xf32> to vector<1x1xf32>
    %41 = math.sqrt %40 : vector<1x1xf32>
    %cst_29 = arith.constant 9.99999996E-13 : f32
    %42 = vector.broadcast %cst_29 : f32 to vector<1x1xf32>
    %43 = arith.maximumf %41, %42 : vector<1x1xf32>
    %44 = vector.broadcast %43 : vector<1x1xf32> to vector<1x8xf32>
    %45 = arith.divf %37, %44 : vector<1x8xf32>
    %46 = math.exp %45 : vector<1x8xf32>
    %cst_30 = arith.constant dense<0.000000e+00> : vector<1xf32>
    %47 = vector.multi_reduction <add>, %46, %cst_30 [1] : vector<1x8xf32> to vector<1xf32>
    %48 = vector.shape_cast %47 : vector<1xf32> to vector<1x1xf32>
    %49 = vector.broadcast %48 : vector<1x1xf32> to vector<1x8xf32>
    %50 = arith.divf %46, %49 : vector<1x8xf32>
    %c0_31 = arith.constant 0 : index
    %c0_32 = arith.constant 0 : index
    %c0_33 = arith.constant 0 : index
    %51 = vector.load %arg2[%c0_31, %c0_32, %c0_33] : memref<2x16x8xf32, #tpu.memory_space<vmem>>, vector<1x16x8xf32>
    %52 = vector.shape_cast %51 : vector<1x16x8xf32> to vector<16x8xf32>
    %53 = vector.broadcast %50 : vector<1x8xf32> to vector<16x8xf32>
    %54 = arith.mulf %52, %53 : vector<16x8xf32>
    %cst_34 = arith.constant dense<0.000000e+00> : vector<16xf32>
    %55 = vector.multi_reduction <add>, %54, %cst_34 [1] : vector<16x8xf32> to vector<16xf32>
    %56 = vector.shape_cast %55 : vector<16xf32> to vector<16x1xf32>
    %57 = vector.extract_strided_slice %28 {offsets = [0, 1], sizes = [16, 1], strides = [1, 1]} : vector<16x2xf32> to vector<16x1xf32>
    %58 = vector.extract_strided_slice %31 {offsets = [0, 8], sizes = [16, 8], strides = [1, 1]} : vector<16x16xf32> to vector<16x8xf32>
    %59 = vector.broadcast %57 : vector<16x1xf32> to vector<16x8xf32>
    %60 = arith.mulf %59, %58 : vector<16x8xf32>
    %cst_35 = arith.constant dense<0.000000e+00> : vector<8xf32>
    %61 = vector.multi_reduction <add>, %60, %cst_35 [0] : vector<16x8xf32> to vector<8xf32>
    %62 = vector.shape_cast %61 : vector<8xf32> to vector<1x8xf32>
    %63 = arith.mulf %62, %62 : vector<1x8xf32>
    %cst_36 = arith.constant dense<0.000000e+00> : vector<1xf32>
    %64 = vector.multi_reduction <add>, %63, %cst_36 [1] : vector<1x8xf32> to vector<1xf32>
    %65 = vector.shape_cast %64 : vector<1xf32> to vector<1x1xf32>
    %66 = math.sqrt %65 : vector<1x1xf32>
    %cst_37 = arith.constant 9.99999996E-13 : f32
    %67 = vector.broadcast %cst_37 : f32 to vector<1x1xf32>
    %68 = arith.maximumf %66, %67 : vector<1x1xf32>
    %69 = vector.broadcast %68 : vector<1x1xf32> to vector<1x8xf32>
    %70 = arith.divf %62, %69 : vector<1x8xf32>
    %71 = math.exp %70 : vector<1x8xf32>
    %cst_38 = arith.constant dense<0.000000e+00> : vector<1xf32>
    %72 = vector.multi_reduction <add>, %71, %cst_38 [1] : vector<1x8xf32> to vector<1xf32>
    %73 = vector.shape_cast %72 : vector<1xf32> to vector<1x1xf32>
    %74 = vector.broadcast %73 : vector<1x1xf32> to vector<1x8xf32>
    %75 = arith.divf %71, %74 : vector<1x8xf32>
    %c1_39 = arith.constant 1 : index
    %c0_40 = arith.constant 0 : index
    %c0_41 = arith.constant 0 : index
    %76 = vector.load %arg2[%c1_39, %c0_40, %c0_41] : memref<2x16x8xf32, #tpu.memory_space<vmem>>, vector<1x16x8xf32>
    %77 = vector.shape_cast %76 : vector<1x16x8xf32> to vector<16x8xf32>
    %78 = vector.broadcast %75 : vector<1x8xf32> to vector<16x8xf32>
    %79 = arith.mulf %77, %78 : vector<16x8xf32>
    %cst_42 = arith.constant dense<0.000000e+00> : vector<16xf32>
    %80 = vector.multi_reduction <add>, %79, %cst_42 [1] : vector<16x8xf32> to vector<16xf32>
    %81 = vector.shape_cast %80 : vector<16xf32> to vector<16x1xf32>
    %82 = tpu.concatenate %56, %81 in 1 : vector<16x1xf32>, vector<16x1xf32> -> vector<16x2xf32>
    %cst_43 = arith.constant dense<0.000000e+00> : vector<16x2xf32>
    %83 = tpu.matmul %6, %82, %cst_43 {dimension_numbers = #tpu.dot_dimension_numbers<[1], [0], [0], [1], [0, 0, 1, 1], [], []>} : vector<16x16xf32>, vector<16x2xf32>, vector<16x2xf32> -> vector<16x2xf32>
    %84 = vector.broadcast %7 : vector<16x1xf32> to vector<16x2xf32>
    %85 = arith.addf %83, %84 : vector<16x2xf32>
    %86 = arith.negf %85 : vector<16x2xf32>
    %87 = math.exp %86 : vector<16x2xf32>
    %cst_44 = arith.constant 1.000000e+00 : f32
    %88 = vector.broadcast %cst_44 : f32 to vector<16x2xf32>
    %89 = arith.addf %88, %87 : vector<16x2xf32>
    %90 = arith.divf %88, %89 : vector<16x2xf32>
    %91 = vector.extract_strided_slice %13 {offsets = [0, 0], sizes = [16, 64], strides = [1, 1]} : vector<16x128xf32> to vector<16x64xf32>
    %92 = vector.extract_strided_slice %90 {offsets = [0, 0], sizes = [16, 1], strides = [1, 1]} : vector<16x2xf32> to vector<16x1xf32>
    %93 = vector.broadcast %92 : vector<16x1xf32> to vector<16x64xf32>
    %94 = arith.mulf %91, %93 : vector<16x64xf32>
    %c0_45 = arith.constant 0 : index
    %c0_46 = arith.constant 0 : index
    %c0_47 = arith.constant 0 : index
    %95 = vector.load %arg11[%c0_45, %c0_46, %c0_47] : memref<2x16x64xf32, #tpu.memory_space<vmem>>, vector<1x16x64xf32>
    %96 = vector.shape_cast %95 : vector<1x16x64xf32> to vector<16x64xf32>
    %97 = vector.shape_cast %94 : vector<16x64xf32> to vector<1x16x64xf32>
    tpu.vector_store %arg11[%c0_45, %c0_46, %c0_47], %97 {strides = array<i32>} : memref<2x16x64xf32, #tpu.memory_space<vmem>>, vector<1x16x64xf32>,
    %98 = vector.extract_strided_slice %13 {offsets = [0, 64], sizes = [16, 64], strides = [1, 1]} : vector<16x128xf32> to vector<16x64xf32>
    %99 = vector.extract_strided_slice %90 {offsets = [0, 1], sizes = [16, 1], strides = [1, 1]} : vector<16x2xf32> to vector<16x1xf32>
    %100 = vector.broadcast %99 : vector<16x1xf32> to vector<16x64xf32>
    %101 = arith.mulf %98, %100 : vector<16x64xf32>
    %c1_48 = arith.constant 1 : index
    %c0_49 = arith.constant 0 : index
    %c0_50 = arith.constant 0 : index
    %102 = vector.load %arg11[%c1_48, %c0_49, %c0_50] : memref<2x16x64xf32, #tpu.memory_space<vmem>>, vector<1x16x64xf32>
    %103 = vector.shape_cast %102 : vector<1x16x64xf32> to vector<16x64xf32>
    %104 = vector.shape_cast %101 : vector<16x64xf32> to vector<1x16x64xf32>
    tpu.vector_store %arg11[%c1_48, %c0_49, %c0_50], %104 {strides = array<i32>} : memref<2x16x64xf32, #tpu.memory_space<vmem>>, vector<1x16x64xf32>,
    return
  }
  func.func @transform_0(%arg0: i32) -> (i32, i32) {
    %c0_i32 = arith.constant 0 : i32
    %c0_i32_0 = arith.constant 0 : i32
    return %c0_i32, %arg0 : i32, i32
  }
  func.func @transform_1(%arg0: i32) -> (i32, i32, i32) {
    %c0_i32 = arith.constant 0 : i32
    %c0_i32_0 = arith.constant 0 : i32
    %c0_i32_1 = arith.constant 0 : i32
    return %arg0, %c0_i32, %c0_i32_0 : i32, i32, i32
  }
  func.func @transform_2(%arg0: i32) -> (i32, i32) {
    %c0_i32 = arith.constant 0 : i32
    %c0_i32_0 = arith.constant 0 : i32
    %c0_i32_1 = arith.constant 0 : i32
    return %c0_i32, %c0_i32_0 : i32, i32
  }
  func.func @transform_3(%arg0: i32) -> (i32, i32) {
    %c0_i32 = arith.constant 0 : i32
    %c0_i32_0 = arith.constant 0 : i32
    %c0_i32_1 = arith.constant 0 : i32
    return %c0_i32, %c0_i32_0 : i32, i32
  }
  func.func @transform_4(%arg0: i32) -> (i32, i32) {
    %c0_i32 = arith.constant 0 : i32
    %c0_i32_0 = arith.constant 0 : i32
    %c0_i32_1 = arith.constant 0 : i32
    return %c0_i32, %c0_i32_0 : i32, i32
  }
  func.func @transform_5(%arg0: i32) -> (i32, i32) {
    %c0_i32 = arith.constant 0 : i32
    %c0_i32_0 = arith.constant 0 : i32
    %c0_i32_1 = arith.constant 0 : i32
    return %c0_i32, %c0_i32_0 : i32, i32
  }
  func.func @transform_6(%arg0: i32) -> (i32, i32) {
    %c0_i32 = arith.constant 0 : i32
    %c0_i32_0 = arith.constant 0 : i32
    %c0_i32_1 = arith.constant 0 : i32
    return %c0_i32, %c0_i32_0 : i32, i32
  }
  func.func @transform_7(%arg0: i32) -> (i32, i32) {
    %c0_i32 = arith.constant 0 : i32
    %c0_i32_0 = arith.constant 0 : i32
    %c0_i32_1 = arith.constant 0 : i32
    return %c0_i32, %c0_i32_0 : i32, i32
  }
  func.func @transform_8(%arg0: i32) -> (i32, i32) {
    %c0_i32 = arith.constant 0 : i32
    %c0_i32_0 = arith.constant 0 : i32
    %c0_i32_1 = arith.constant 0 : i32
    return %c0_i32, %c0_i32_0 : i32, i32
  }
  func.func @transform_9(%arg0: i32) -> (i32, i32) {
    %c0_i32 = arith.constant 0 : i32
    %c0_i32_0 = arith.constant 0 : i32
    %c0_i32_1 = arith.constant 0 : i32
    return %c0_i32, %c0_i32_0 : i32, i32
  }
  func.func @transform_10(%arg0: i32) -> (i32, i32, i32) {
    %c0_i32 = arith.constant 0 : i32
    %c0_i32_0 = arith.constant 0 : i32
    %c0_i32_1 = arith.constant 0 : i32
    return %arg0, %c0_i32, %c0_i32_0 : i32, i32, i32
  }
}

</mosaic_0001>

<bundles_post_ra>
// kernel: tpu_custom_call.1
= control target key start
LH: loop header
LB: loop body
LE: loop exit
PB: predicated region body
PF: predicated region fallthrough
CT: control target
= control target key end

     0   :  { %15 = vsyncpa [#allocation3], 0  ;;  %s1086_s0 = inlined_call_operand.hbm [shape: f32[144,128], index: 0, kind: input, shape index: {}]   ;;  %s1087_s1 = inlined_call_operand.vmem [shape: f32[2,16,8], index: 1, kind: input, shape index: {}]   ;;  %s1088_s2 = inlined_call_operand.vmem [shape: f32[16,144], index: 2, kind: input, shape index: {}]   ;;  %s1089_s3 = inlined_call_operand.vmem [shape: f32[16,1], index: 3, kind: input, shape index: {}]   ;;  %s1090_s4 = inlined_call_operand.vmem [shape: f32[16,16], index: 4, kind: input, shape index: {}]   ;;  %s1091_s5 = inlined_call_operand.vmem [shape: f32[16,1], index: 5, kind: input, shape index: {}]   ;;  %s1092_s6 = inlined_call_operand.vmem [shape: f32[16,16], index: 6, kind: input, shape index: {}]   ;;  %s1093_s7 = inlined_call_operand.vmem [shape: f32[16,1], index: 7, kind: input, shape index: {}]   ;;  %s1094_s8 = inlined_call_operand.vmem [shape: f32[16,16], index: 8, kind: input, shape index: {}]   ;;  %s1095_s9 = inlined_call_operand.vmem [shape: f32[16,1], index: 9, kind: input, shape index: {}]   ;;  %s1096_s10 = inlined_call_operand.hbm [shape: f32[2,16,64], index: 10, kind: output, shape index: {}]  }
   0x1   :  { %16 = vsyncpa [#allocation4], 0  ;;  %s849_s13 = smov [#allocation2]   ;;  %s801_s17 = scalar_lea.hbm %s1086_s0, 2304 }
   0x2   :  { %s22_s14 = sshll.u32 %s849_s13, 4  ;;  %p802_p0 = scmp.ne.s32.totalorder %s1086_s0, %s801_s17  ;;  %s23_s14 = int_to_ptr.vmem [resolvable:$true] %s22_s14 }
   0x3   :  { %p805_p1 = scmp.lt.u32.totalorder %s801_s17, %s1086_s0 }
   0x5   :  { %p807_p2 = pnand %p805_p1, %p802_p0 }
   0x7   :  { %810 = shalt.err (!%p807_p2)
}
   0x8   :  { %s811_s22 = scalar_lea.vmem %s23_s14, 2304  ;;  %p816_p4 = scmp.lt.s32.totalorder %s23_s14, %s23_s14 }
   0x9   :  { %p812_p3 = scmp.ne.s32.totalorder %s23_s14, %s811_s22  ;;  %p817_p5 = scmp.lt.s32.totalorder %s811_s22, %s811_s22 }
   0xb   :  { %p818_p6 = por %p817_p5, %p816_p4 }
   0xd   :  { %p819_p7 = pnand %p818_p6, %p812_p3 }
   0xf   :  { %822 = shalt.err (!%p819_p7)
}
  0x10   :  { %s850_s23 = smov 128   ;;  %s851_s24 = smov 8  }
  0x11   :  { %28 = dma.hbm_to_vmem [thread:$0]  %s1086_s0, 2304, %s23_s14, [#allocation3], %s850_s23, %s850_s23, %s851_s24  }
  0x12   :  { %845 = dma.done.wait [#allocation3], 2304  }
  0x13   :  { %846 = vsyncadd [#allocation3], 4294964992  ;;  %v852_v0 = vmov 0.0|0.0   ;;  %v853_v1 = vmov 0   ;;  %v68_v2 = vld [vmem:[#allocation2] sm:$0xff]  ;;  %v69_v3 = vld [vmem:[#allocation2 + $0x8] sm:$0xff] }
  0x14   :  { %715 = vmatprep.subr.bf16.mxu0 %v852_v0  ;;  %763 = vset.pattern.permute.xlu0 %v853_v1  ;;  %v70_v4 = vld [vmem:[#allocation2 + $0x10] sm:$0xff]  ;;  %v716_v5 = vpack.c.bf16 %v69_v3, %v68_v2  ;;  %v71_v6 = vld [vmem:[#allocation2 + $0x18] sm:$0xff]  ;;  %v72_v8 = vld [vmem:[#allocation2 + $0x20] sm:$0xff]  ;;  %vm96_vm0 = vcmask 130048   ;;  %vm180_vm1 = vcmask 523264   ;;  %s854_s17 = smov 64  }
  0x15   :  { %769 = vset.pattern.permute.xlu1 %v853_v1  ;;  %v719_v7 = vpack.c.bf16 %v71_v6, %v70_v4  ;;  %v73_v9 = vld [vmem:[#allocation2 + $0x28] sm:$0xff]  ;;  %v54_v12 = vld [vmem:[%s1089_s3] sm:$0xff]  ;;  %v74_v13 = vld [vmem:[#allocation2 + $0x30] sm:$0xff]  ;;  %vm217_vm2 = vcmask 64512   ;;  %vm201_vm3 = vcmask 7168   ;;  %vm462_vm4 = vcmask 130112  }
  0x16   :  { %717 = vmatpush1.bf16.msra.mxu0 %v716_v5  ;;  %v51_v10 = vld [vmem:[%s1088_s2 + $0x8] sm:$0xff]  ;;  %v722_v11 = vpack.c.bf16 %v73_v9, %v72_v8  ;;  %v75_v14 = vld [vmem:[#allocation2 + $0x38] sm:$0xff]  ;;  %88 = vperm.xlu0 %763, %v54_v12   ;;  %v76_v17 = vld [vmem:[#allocation2 + $0x40] sm:$0xff] }
  0x17   :  { %718 = vmatprep.subr.bf16.mxu0 %v852_v0  ;;  %670 = vmatprep.mubr.msk.f32.mxu0 %vm96_vm0, %v51_v10  ;;  %v55_v15 = vld [vmem:[%s1089_s3 + $0x8] sm:$0xff]  ;;  %v725_v16 = vpack.c.bf16 %v75_v14, %v74_v13  ;;  %v78_v20 = vld [vmem:[#allocation2 + $0x50] sm:$0xff]  ;;  %v79_v21 = vld [vmem:[#allocation2 + $0x58] sm:$0xff]  ;;  %v855_v14 = vmov 1  }
  0x18   :  { %v77_v18 = vld [vmem:[#allocation2 + $0x48] sm:$0xff]  ;;  %v731_v22 = vpack.c.bf16 %v79_v21, %v78_v20  ;;  %v80_v23 = vld [vmem:[#allocation2 + $0x60] sm:$0xff]  ;;  %v82_v26 = vld [vmem:[#allocation2 + $0x70] sm:$0xff] }
  0x19   :  { %v728_v19 = vpack.c.bf16 %v77_v18, %v76_v17  ;;  %v81_v24 = vld [vmem:[#allocation2 + $0x68] sm:$0xff]  ;;  %v83_v27 = vld [vmem:[#allocation2 + $0x78] sm:$0xff]  ;;  %v84_v29 = vld [vmem:[#allocation2 + $0x80] sm:$0xff] }
  0x1a   :  { %720 = vmatpush1.bf16.msra.mxu0 %v719_v7  ;;  %93 = vperm.xlu0 %763, %v55_v15   ;;  %v734_v25 = vpack.c.bf16 %v81_v24, %v80_v23  ;;  %v737_v28 = vpack.c.bf16 %v83_v27, %v82_v26  ;;  %v85_v30 = vld [vmem:[#allocation2 + $0x88] sm:$0xff]  ;;  %v50_v32 = vld [vmem:[%s1088_s2] sm:$0xff]  ;;  %v53_v33 = vld [vmem:[%s1088_s2 + $0x18] sm:$0xff] }
  0x1b   :  { %721 = vmatprep.subr.bf16.mxu0 %v852_v0  ;;  %v740_v31 = vpack.c.bf16 %v85_v30, %v84_v29  ;;  %v52_v34 = vld [vmem:[%s1088_s2 + $0x10] sm:$0xff]  ;;  %v970_v48 = vld [vmem:[%s1087_s1 + $0x18] sm:$0xff]  ;;  %v56_v54 = vld [vmem:[%s1090_s4] sm:$0xff] }
  0x1c   :  { %v965_v47 = vld [vmem:[%s1087_s1 + $0x10] sm:$0xff]  ;;  %v58_v55 = vld [vmem:[%s1091_s5] sm:$0xff]  ;;  %698 = vmatprep.mubr.msk.f32.mxu1 %vm96_vm0, %v56_v54  ;;  %v63_v56 = vld [vmem:[%s1093_s7 + $0x8] sm:$0xff] }
  0x1d   :  { %v764_v49 = vpack.i.bf16 %v970_v48, %v965_v47  ;;  %v59_v57 = vld [vmem:[%s1091_s5 + $0x8] sm:$0xff]  ;;  %v62_v58 = vld [vmem:[%s1093_s7] sm:$0xff] }
  0x1e   :  { %723 = vmatpush1.bf16.msra.mxu0 %v722_v11  ;;  %v996_v2 = vld [vmem:[%s1087_s1] sm:$0xff]  ;;  %v1001_v3 = vld [vmem:[%s1087_s1 + $0x8] sm:$0xff] }
  0x1f   :  { %724 = vmatprep.subr.bf16.mxu0 %v852_v0  ;;  %v57_v11 = vld [vmem:[%s1090_s4 + $0x8] sm:$0xff]  ;;  %v60_v12 = vld [vmem:[%s1092_s6] sm:$0xff]  ;;  %s856_s4 = smov 120  }
  0x20   :  { %v61_v13 = vld [vmem:[%s1092_s6 + $0x8] sm:$0xff] }
  0x22   :  { %726 = vmatpush1.bf16.msra.mxu0 %v725_v16 }
  0x23   :  { %727 = vmatprep.subr.bf16.mxu0 %v852_v0 }
  0x26   :  { %729 = vmatpush1.bf16.msra.mxu0 %v728_v19 }
  0x27   :  { %730 = vmatprep.subr.bf16.mxu0 %v852_v0 }
  0x2a   :  { %732 = vmatpush1.bf16.msra.mxu0 %v731_v22 }
  0x2b   :  { %733 = vmatprep.subr.bf16.mxu0 %v852_v0 }
  0x2e   :  { %735 = vmatpush1.bf16.msra.mxu0 %v734_v25 }
  0x2f   :  { %736 = vmatprep.subr.bf16.mxu0 %v852_v0 }
  0x32   :  { %738 = vmatpush1.bf16.msra.mxu0 %v737_v28 }
  0x33   :  { %739 = vmatprep.subr.bf16.mxu0 %v852_v0 }
  0x36   :  { %741 = vmatpush1.bf16.msra.mxu0 %v740_v31 }
  0x39   :  { %168 = vmatmul.mubr.f32.vlgmr.msra.gmra.mrb[0].mxu0 %v50_v32 }
  0x3a   :  { %671 = vmatprep.mubr.msk.f32.mxu0 %vm96_vm0, %v53_v33 }
  0x3d   :  { %173 = vmatmul.mubr.f32.gmra.mrb[2].mxu0 %v52_v34 }
  0x95   :  { %v89_v35 = vpop.permute.xlu0 %88 }
  0x99   :  { %v94_v40 = vpop.permute.xlu0 %93 }
 0x10c   :  { %v169_v36 = vpop.f32.mrb[0].mxu0 }
 0x10d   :  { %v170_v37 = vadd.f32 %v169_v36, %v89_v35  ;;  %v171_v38 = vpop.f32.mrb[1].mxu0 }
 0x10f   :  { %v950_v39 = vmax.f32 %v170_v37, 0.0 }
 0x110   :  { %v174_v41 = vpop.f32.mrb[2].mxu0 }
 0x111   :  { %v175_v42 = vadd.f32 %v174_v41, %v94_v40  ;;  %v176_v43 = vpop.f32.mrb[3].mxu0  ;;  %189 = vrot.lane.b32.xlu1 %v950_v39, %s854_s17  ;;  %v181_v44 = vsel %vm180_vm1, %v950_v39, 0.0 }
 0x112   :  { %182 = vadd.xlane.f32.xlu0 %v181_v44 }
 0x113   :  { %v956_v45 = vmax.f32 %v175_v42, 0.0 }
 0x115   :  { %191 = vrot.lane.b32.xlu1 %v956_v45, %s854_s17  ;;  %v184_v46 = vsel %vm180_vm1, %v956_v45, 0.0 }
 0x139   :  { %185 = vadd.xlane.f32.xlu1 %v184_v46 }
 0x14a   :  { %765 = vrot.lane.b32.xlu1 %v764_v49, %s851_s24 }
 0x14e   :  { %227 = vperm.xlu1 %769, %v59_v57  }
 0x152   :  { %313 = vperm.xlu1 %769, %v62_v58  }
 0x156   :  { %770 = vset.pattern.permute.xlu1 %v855_v14 }
 0x183   :  { %v190_v50 = vpop.permute.xlu1 %189 }
 0x184   :  { %v195_v51 = vsel %vm180_vm1, %v190_v50, 0.0 }
 0x185   :  { %196 = vadd.xlane.f32.xlu0 %v195_v51 }
 0x187   :  { %v192_v52 = vpop.permute.xlu1 %191 }
 0x188   :  { %v198_v53 = vsel %vm180_vm1, %v192_v52, 0.0 }
 0x189   :  { %199 = vadd.xlane.f32.xlu0 %v198_v53 }
 0x19f   :  { %222 = vperm.xlu0 %763, %v58_v55   ;;  %v183_v60 = vpop.xlane.xlu0 %182 }
 0x1a3   :  { %318 = vperm.xlu0 %763, %v63_v56  }
 0x1a7   :  { %771 = vset.pattern.permute.xlu0 %v855_v14 }
 0x1c6   :  { %v186_v59 = vpop.xlane.xlu1 %185 }
 0x1ca   :  { %v766_v61 = vpop.permute.xlu1 %765 }
 0x1cb   :  { %v768_v62 = vunpack.i.h.bf16 %v766_v61  ;;  %v767_v63 = vunpack.i.l.bf16 %v766_v61 }
 0x1cd   :  { %v218_v4 = vsel %vm217_vm2, %v996_v2, %v767_v63  ;;  %v219_v5 = vsel %vm217_vm2, %v1001_v3, %v768_v62 }
 0x1ce   :  { %v746_v10 = vpack.c.bf16 %v219_v5, %v218_v4  ;;  %v228_v15 = vpop.permute.xlu1 %227 }
 0x1d2   :  { %v314_v24 = vpop.permute.xlu1 %313 }
 0x212   :  { %v197_v0 = vpop.xlane.xlu0 %196 }
 0x213   :  { %v202_v7 = vsel %vm201_vm3, %v183_v60, %v197_v0 }
 0x216   :  { %v200_v6 = vpop.xlane.xlu0 %199 }
 0x217   :  { %v203_v8 = vsel %vm201_vm3, %v186_v59, %v200_v6 }
 0x218   :  { %v742_v9 = vpack.c.bf16 %v203_v8, %v202_v7 }
 0x21a   :  { %743 = vmatprep.subr.bf16.mxu1 %v742_v9 }
 0x21b   :  { %745 = vmatpush3.bf16.msra.mxu1 %v742_v9 }
 0x21c   :  { %747 = vmatprep.subr.bf16.mxu1 %v746_v10 }
 0x21e   :  { %699 = vmatmul.mubr.msk.f32.vlgmr.msra.gmra.mrb[0].mxu1 %vm96_vm0, %v57_v11  ;;  %v223_v17 = vpop.permute.xlu0 %222 }
 0x21f   :  { %749 = vmatpush3.bf16.msra.mxu1 %v746_v10  ;;  %705 = vmatprep.mubr.msk.f32.mxu1 %vm96_vm0, %v60_v12 }
 0x222   :  { %706 = vmatmul.mubr.msk.f32.vlgmr.msra.gmra.mrb[2].mxu1 %vm96_vm0, %v61_v13  ;;  %v319_v23 = vpop.permute.xlu0 %318 }
 0x2f1   :  { %v700_v16 = vpop.f32.mrb[0].mxu1 }
 0x2f2   :  { %v308_v18 = vadd.f32 %v700_v16, %v228_v15  ;;  %v302_v19 = vpop.f32.mrb[1].mxu1 }
 0x2f3   :  { %v303_v20 = vadd.f32 %v302_v19, %v223_v17 }
 0x2f4   :  { %457 = vperm.xlu0 %771, %v308_v18  }
 0x2f5   :  { %v707_v21 = vpop.f32.mrb[2].mxu1  ;;  %453 = vperm.xlu1 %770, %v303_v20  }
 0x2f6   :  { %v393_v22 = vpop.f32.mrb[3].mxu1  ;;  %v399_v25 = vadd.f32 %v707_v21, %v319_v23 }
 0x2f7   :  { %v394_v26 = vadd.f32 %v393_v22, %v314_v24 }
 0x2f8   :  { %772 = vset.pattern.permute.xlu0 %v853_v1 }
 0x2f9   :  { %404 = vperm.xlu0 %772, %v303_v20   ;;  %774 = vset.pattern.permute.xlu1 %v853_v1 }
 0x2fd   :  { %409 = vperm.xlu0 %772, %v308_v18  }
 0x373   :  { %v458_v27 = vpop.permute.xlu0 %457 }
 0x374   :  { %v461_v28 = vmul.f32 %v458_v27, %v399_v25  ;;  %v454_v29 = vpop.permute.xlu1 %453 }
 0x375   :  { %v460_v30 = vmul.f32 %v454_v29, %v394_v26 }
 0x376   :  { %v464_v31 = vsel %vm462_vm4, %v461_v28, 0.0 }
 0x377   :  { %v463_v32 = vsel %vm462_vm4, %v460_v30, 0.0 }
 0x378   :  { %v465_v33 = vadd.f32 %v464_v31, %v463_v32  ;;  %v405_v34 = vpop.permute.xlu0 %404 }
 0x379   :  { %v412_v36 = vmul.f32 %v405_v34, %v394_v26 }
 0x37a   :  { %v466_v35 = vrot.slane %v465_v33, 4 }
 0x37b   :  { %v414_v42 = vsel %vm217_vm2, %v412_v36, 0.0 }
 0x37c   :  { %v467_v37 = vadd.f32 %v466_v35, %v465_v33  ;;  %v410_v38 = vpop.permute.xlu0 %409 }
 0x37d   :  { %v413_v40 = vmul.f32 %v410_v38, %v399_v25 }
 0x37e   :  { %v468_v41 = vrot.slane %v467_v37, 2 }
 0x37f   :  { %v415_v43 = vsel %vm217_vm2, %v413_v40, 0.0 }
 0x380   :  { %v469_v44 = vadd.f32 %v468_v41, %v467_v37  ;;  %v416_v46 = vadd.f32 %v415_v43, %v414_v42 }
 0x382   :  { %v470_v49 = vrot.slane %v469_v44, 1  ;;  %v417_v4 = vrot.slane %v416_v46, 4 }
 0x384   :  { %v471_v50 = vadd.f32 %v470_v49, %v469_v44  ;;  %v418_v5 = vadd.f32 %v417_v4, %v416_v46 }
 0x386   :  { %v472_v51 = vmul.f32 %v471_v50, %v471_v50  ;;  %v419_v6 = vrot.slane %v418_v5, 2 }
 0x388   :  { %474 = vrot.lane.b32.xlu1 %v472_v51, %s856_s4  ;;  %v420_v7 = vadd.f32 %v419_v6, %v418_v5 }
 0x38a   :  { %v421_v8 = vrot.slane %v420_v7, 1 }
 0x38c   :  { %v422_v9 = vadd.f32 %v421_v8, %v420_v7 }
 0x38e   :  { %v423_v10 = vmul.f32 %v422_v9, %v422_v9 }
 0x390   :  { %v424_v11 = vsel %vm217_vm2, %v423_v10, 0.0 }
 0x3fa   :  { %v475_v52 = vpop.permute.xlu1 %474 }
 0x3fb   :  { %v477_v53 = vsel %vm217_vm2, %v475_v52, 0.0  ;;  %v65_v52 = vld [vmem:[%s1094_s8 + $0x8] sm:$0xff] }
 0x3fc   :  { %478 = vadd.xlane.f32.xlu1 %v477_v53 }
 0x489   :  { %v479_v54 = vpop.xlane.xlu1 %478 }
 0x48a   :  { %777 = vrsqrt.f32 %v479_v54  ;;  %vm482_vm5 = vcmp.eq.f32.partialorder %v479_v54, inf  ;;  %v485_v57 = vand.u32 2147483648, %v479_v54  ;;  %vm484_vm6 = vcmp.eq.f32.partialorder %v479_v54, 0.0 }
 0x494   :  { %v778_v55 = vpop.eup %777 }
 0x495   :  { %v481_v56 = vmul.f32 %v778_v55, %v479_v54 }
 0x497   :  { %v483_v58 = vsel %vm482_vm5, %v479_v54, %v481_v56 }
 0x498   :  { %v486_v59 = vsel %vm484_vm6, %v485_v57, %v483_v58 }
 0x499   :  { %v487_v60 = vmax.f32 %v486_v59, 1e-12 }
 0x49b   :  { %779 = vrcp.f32 %v487_v60 }
 0x4a5   :  { %v780_v61 = vpop.eup %779 }
 0x4a6   :  { %v489_v62 = vmul.f32 %v780_v61, %v471_v50 }
 0x4a8   :  { %v490_v63 = vmul.f32 1.442695, %v489_v62 }
 0x4aa   :  { %781 = vpow2.f32 %v490_v63 }
 0x4b4   :  { %v782_v0 = vpop.eup %781 }
 0x4b5   :  { %493 = vrot.lane.b32.xlu0 %v782_v0, %s856_s4 }
 0x4d4   :  { %425 = vadd.xlane.f32.xlu0 %v424_v11 }
 0x527   :  { %v494_v12 = vpop.permute.xlu0 %493 }
 0x528   :  { %v496_v13 = vsel %vm217_vm2, %v494_v12, 0.0 }
 0x529   :  { %497 = vadd.xlane.f32.xlu1 %v496_v13 }
 0x561   :  { %v426_v15 = vpop.xlane.xlu0 %425 }
 0x562   :  { %783 = vrsqrt.f32 %v426_v15  ;;  %vm429_vm7 = vcmp.eq.f32.partialorder %v426_v15, inf  ;;  %v432_v18 = vand.u32 2147483648, %v426_v15  ;;  %vm431_vm8 = vcmp.eq.f32.partialorder %v426_v15, 0.0 }
 0x56c   :  { %v784_v16 = vpop.eup %783 }
 0x56d   :  { %v428_v17 = vmul.f32 %v784_v16, %v426_v15 }
 0x56f   :  { %v430_v19 = vsel %vm429_vm7, %v426_v15, %v428_v17 }
 0x570   :  { %v433_v20 = vsel %vm431_vm8, %v432_v18, %v430_v19 }
 0x571   :  { %v434_v21 = vmax.f32 %v433_v20, 1e-12 }
 0x573   :  { %785 = vrcp.f32 %v434_v21 }
 0x57d   :  { %v786_v22 = vpop.eup %785 }
 0x57e   :  { %v436_v23 = vmul.f32 %v786_v22, %v422_v9 }
 0x580   :  { %v437_v24 = vmul.f32 1.442695, %v436_v23 }
 0x582   :  { %787 = vpow2.f32 %v437_v24 }
 0x58c   :  { %v788_v25 = vpop.eup %787 }
 0x58d   :  { %v439_v26 = vsel %vm217_vm2, %v788_v25, 0.0 }
 0x58e   :  { %440 = vadd.xlane.f32.xlu1 %v439_v26 }
 0x5b6   :  { %v498_v27 = vpop.xlane.xlu1 %497 }
 0x5b7   :  { %789 = vrcp.f32 %v498_v27 }
 0x5c1   :  { %v790_v28 = vpop.eup %789 }
 0x5c2   :  { %v500_v29 = vmul.f32 %v790_v28, %v782_v0 }
 0x5c4   :  { %502 = vrot.lane.b32.xlu1 %v500_v29, %s856_s4 }
 0x61b   :  { %v441_v30 = vpop.xlane.xlu1 %440 }
 0x61c   :  { %791 = vrcp.f32 %v441_v30 }
 0x626   :  { %v792_v31 = vpop.eup %791 }
 0x627   :  { %v443_v32 = vmul.f32 %v792_v31, %v788_v25 }
 0x629   :  { %v444_v33 = vmul.f32 %v443_v32, %v996_v2  ;;  %v445_v35 = vmul.f32 %v443_v32, %v1001_v3  ;;  %v64_v2 = vld [vmem:[%s1094_s8] sm:$0xff]  ;;  %s857_s8 = smov [#allocation5]  }
 0x62a   :  { %v66_v3 = vld [vmem:[%s1095_s9] sm:$0xff]  ;;  %712 = vmatprep.mubr.msk.f32.mxu1 %vm96_vm0, %v64_v2 }
 0x62b   :  { %v446_v34 = vsel %vm217_vm2, %v444_v33, 0.0  ;;  %v449_v36 = vsel %vm217_vm2, %v445_v35, 0.0 }
 0x62c   :  { %447 = vadd.xlane.f32.xlu0 %v446_v34 }
 0x630   :  { %450 = vadd.xlane.f32.xlu0 %v449_v36 }
 0x636   :  { %v503_v37 = vpop.permute.xlu1 %502 }
 0x637   :  { %v505_v38 = vmul.f32 %v965_v47, %v503_v37  ;;  %v506_v40 = vmul.f32 %v970_v48, %v503_v37  ;;  %v67_v47 = vld [vmem:[%s1095_s9 + $0x8] sm:$0xff]  ;;  %s658_s9 = sshll.u32 %s857_s8, 4  ;;  %s659_s9 = int_to_ptr.vmem [resolvable:$true] %s658_s9 }
 0x638   :  { %s823_s0 = scalar_lea.vmem %s659_s9, 512  ;;  %p828_p9 = scmp.lt.s32.totalorder %s659_s9, %s659_s9 }
 0x639   :  { %v510_v41 = vsel %vm217_vm2, %v506_v40, 0.0  ;;  %v507_v42 = vsel %vm217_vm2, %v505_v38, 0.0  ;;  %p824_p8 = scmp.ne.s32.totalorder %s659_s9, %s823_s0  ;;  %p829_p10 = scmp.lt.s32.totalorder %s823_s0, %s823_s0 }
 0x63a   :  { %511 = vadd.xlane.f32.xlu1 %v510_v41  ;;  %508 = vadd.xlane.f32.xlu0 %v507_v42 }
 0x63b   :  { %p830_p11 = por %p829_p10, %p828_p9 }
 0x63d   :  { %p831_p12 = pnand %p830_p11, %p824_p8 }
 0x650   :  { %517 = vperm.xlu0 %772, %v66_v3  }
 0x654   :  { %522 = vperm.xlu0 %772, %v67_v47  }
 0x658   :  { %773 = vset.pattern.permute.xlu0 %v855_v14 }
 0x6b9   :  { %v448_v48 = vpop.xlane.xlu0 %447 }
 0x6bd   :  { %v451_v43 = vpop.xlane.xlu0 %450 }
 0x6c7   :  { %v512_v44 = vpop.xlane.xlu1 %511  ;;  %v509_v46 = vpop.xlane.xlu0 %508 }
 0x6c8   :  { %v514_v49 = vsel %vm201_vm3, %v451_v43, %v512_v44  ;;  %v513_v50 = vsel %vm201_vm3, %v448_v48, %v509_v46 }
 0x6c9   :  { %v750_v51 = vpack.c.bf16 %v514_v49, %v513_v50 }
 0x6cb   :  { %751 = vmatprep.subr.bf16.mxu1 %v750_v51 }
 0x6cc   :  { %753 = vmatpush3.bf16.msra.mxu1 %v750_v51 }
 0x6cf   :  { %713 = vmatmul.mubr.msk.f32.vlgmr.msra.gmra.mrb[4].mxu1 %vm96_vm0, %v65_v52  ;;  %v518_v53 = vpop.permute.xlu0 %517 }
 0x6d3   :  { %v523_v54 = vpop.permute.xlu0 %522 }
 0x7a2   :  { %v714_v55 = vpop.f32.mrb[4].mxu1 }
 0x7a3   :  { %v603_v56 = vadd.f32 %v714_v55, %v523_v54  ;;  %v597_v57 = vpop.f32.mrb[5].mxu1 }
 0x7a4   :  { %v598_v58 = vadd.f32 %v597_v57, %v518_v53 }
 0x7a5   :  { %v681_v59 = vmul.f32 -1.442695, %v603_v56 }
 0x7a6   :  { %v680_v60 = vmul.f32 -1.442695, %v598_v58 }
 0x7a7   :  { %793 = vpow2.f32 %v681_v59 }
 0x7a8   :  { %795 = vpow2.f32 %v680_v60 }
 0x7b1   :  { %v794_v61 = vpop.eup %793 }
 0x7b2   :  { %v796_v62 = vpop.eup %795  ;;  %v613_v0 = vadd.f32 1.0, %v794_v61 }
 0x7b3   :  { %v612_v63 = vadd.f32 1.0, %v796_v62 }
 0x7b5   :  { %797 = vrcp.f32 %v612_v63 }
 0x7b6   :  { %799 = vrcp.f32 %v613_v0 }
 0x7bf   :  { %v798_v4 = vpop.eup %797 }
 0x7c0   :  { %620 = vperm.xlu1 %774, %v798_v4   ;;  %633 = vperm.xlu0 %773, %v798_v4   ;;  %v800_v5 = vpop.eup %799 }
 0x7c4   :  { %637 = vperm.xlu0 %773, %v800_v5  }
 0x7c8   :  { %775 = vset.pattern.permute.xlu0 %v853_v1 }
 0x7c9   :  { %625 = vperm.xlu0 %775, %v800_v5  }
 0x7cd   :  { %776 = vset.pattern.permute.xlu0 %v855_v14 }
 0x83f   :  { %v621_v6 = vpop.permute.xlu1 %620  ;;  %v634_v7 = vpop.permute.xlu0 %633 }
 0x840   :  { %v628_v8 = vmul.f32 %v621_v6, %v950_v39  ;;  %v640_v9 = vmul.f32 %v634_v7, %v950_v39 }
 0x842   :  { %630 = vst.msk [vmem:[#allocation5] sm:$0xff] %vm180_vm1, %v628_v8  ;;  %644 = vrot.lane.b32.xlu0 %v640_v9, %s854_s17 }
 0x843   :  { %v638_v10 = vpop.permute.xlu0 %637 }
 0x844   :  { %v641_v11 = vmul.f32 %v638_v10, %v956_v45 }
 0x846   :  { %646 = vrot.lane.b32.xlu0 %v641_v11, %s854_s17 }
 0x848   :  { %v626_v12 = vpop.permute.xlu0 %625 }
 0x849   :  { %v629_v1 = vmul.f32 %v626_v12, %v956_v45 }
 0x84b   :  { %631 = vst.msk [vmem:[#allocation5 + $0x8] sm:$0xff] %vm180_vm1, %v629_v1 }
 0x8b4   :  { %v645_v14 = vpop.permute.xlu0 %644 }
 0x8b5   :  { %651 = vst.msk [vmem:[#allocation5 + $0x10] sm:$0xff] %vm180_vm1, %v645_v14 }
 0x8b8   :  { %v647_v39 = vpop.permute.xlu0 %646 }
 0x8b9   :  { %652 = vst.msk [vmem:[#allocation5 + $0x18] sm:$0xff] %vm180_vm1, %v647_v39 }
 0x8ba   :  { %834 = shalt.err (!%p831_p12)
}
 0x8bb   :  { %s835_s28 = scalar_lea.hbm %s1096_s10, 512 }
 0x8bc   :  { %p836_p13 = scmp.ne.s32.totalorder %s1096_s10, %s835_s28  ;;  %p839_p0 = scmp.lt.u32.totalorder %s835_s28, %s1096_s10 }
 0x8be   :  { %p841_p1 = pnand %p839_p0, %p836_p13 }
 0x8c0   :  { %844 = shalt.err (!%p841_p1)
}
 0x8c1   :  { %664 = dma.vmem_to_hbm [thread:$0]  %s659_s9, 512, %s1096_s10, [#allocation4], %s850_s23, %s850_s23, %s851_s24  }
 0x8c2   :  { %847 = dma.done.wait [#allocation4], 512  }
 0x8c3   :  { %848 = vsyncadd [#allocation4], 4294966784 }
 0x8c4   :  { %668 = vsyncpa [#allocation3], 1 }
 0x8c5   :  { %669 = vsyncpa [#allocation4], 1 }

</bundles_post_ra>
